<compile_context>
chip_gen: v7x
topology: tpu7x:2x2x1
jax: 0.10.0
libtpu: 0.0.40
codegen_flags: <defaults>
</compile_context>

<pallas_src>
import jax
import jax.numpy as jnp
from jax.experimental import pallas as pl
from jax.experimental.pallas import tpu as pltpu

_LANE = 128
_SUBLANE = 8


def _identity_copy_kernel(x_ref, y_ref):
    # Identity "transform": z = x (forward) and x = z (reverse) are the same op.
    y_ref[...] = x_ref[...]


def _vmem_capacity_bytes() -> int:
    """Best-effort per-core VMEM capacity; conservative fallback (v7x = 64 MiB)."""
    try:
        info = pltpu.get_tpu_info()
        for attr in ("vmem_capacity_bytes", "vmem_bytes", "vmem_size_bytes"):
            v = getattr(info, attr, None)
            if isinstance(v, int) and v > 0:
                return v
    except Exception:
        pass
    return 64 * 1024 * 1024


def _choose_row_tile(rows: int, itemsize: int, block_cap_bytes: int) -> int:
    """Largest 8-multiple row tile within the per-block byte cap."""
    max_rows = (block_cap_bytes // (_LANE * itemsize)) // _SUBLANE * _SUBLANE
    max_rows = max(_SUBLANE, max_rows)
    if rows <= max_rows:
        # Single full-extent block: always a legal block shape.
        return rows
    return max_rows


def invertible_module_forward(x, rev: bool = False, jac: bool = True,
                              skip_kernel: bool = False):
    """Pallas equivalent of InvertibleModule.forward([x], rev=rev, jac=jac).

    Args:
      x: (B, C, H, W) array (NCHW, PyTorch convention).
      rev: direction flag (the identity map is self-inverse; accepted but does
           not change the computation).
      jac: whether to return the log-det Jacobian (zeros of shape (B,)).
      skip_kernel: if True, elide the pallas_call entirely (identity needs no
           HBM traffic) - the fastest correct realization of the contract.

    Returns:
      ((z,), log_det) with z same shape/dtype as x and log_det of shape (B,)
      float32 (all zeros), or ((z,), None) if jac=False.
    """
    B, C, H, W = x.shape
    total = B * C * H * W
    itemsize = jnp.dtype(x.dtype).itemsize

    log_det = jnp.zeros((B,), jnp.float32) if jac else None

    if skip_kernel:
        # Metadata-only path: the identity contract needs zero bytes of HBM traffic.
        return (x,), log_det

    # Flatten batch + features together and view as (rows, 128): every block is
    # a stack of full (8, 128) vregs and a contiguous HBM slab.
    flat = x.reshape(total)
    pad = (-total) % _LANE
    if pad:
        # TODO(synk): padding copies x once; only hit when total % 128 != 0.
        flat = jnp.pad(flat, (0, pad))
    rows = (total + pad) // _LANE
    x2d = flat.reshape(rows, _LANE)

    vmem_bytes = _vmem_capacity_bytes()
    block_cap = min(16 * 1024 * 1024, vmem_bytes // 8)   # ~8 MiB on v7x, 16 MiB on v5e/v6e
    row_tile = _choose_row_tile(rows, itemsize, block_cap)
    grid = (pl.cdiv(rows, row_tile),)

    # Pipelined footprint: 2x in + 2x out double buffers = 4 blocks (+ headroom).
    vmem_limit = min(vmem_bytes, 4 * row_tile * _LANE * itemsize + (4 << 20))

    z2d = pl.pallas_call(
        _identity_copy_kernel,
        out_shape=jax.ShapeDtypeStruct((rows, _LANE), x.dtype),
        grid=grid,
        in_specs=[pl.BlockSpec((row_tile, _LANE), lambda i: (i, 0))],
        out_specs=pl.BlockSpec((row_tile, _LANE), lambda i: (i, 0)),
        # Alias output onto the input buffer; only truly in-place if the caller
        # donates x (otherwise XLA inserts a defensive copy - still correct).
        input_output_aliases={0: 0},
        compiler_params=pltpu.CompilerParams(
            dimension_semantics=("parallel",),
            vmem_limit_bytes=int(vmem_limit)),
        cost_estimate=pl.CostEstimate(
            flops=0,
            transcendentals=0,
            bytes_accessed=2 * total * itemsize),
    )(x2d)

    z_flat = z2d.reshape(rows * _LANE)
    if pad:
        z_flat = z_flat[:total]
    z = z_flat.reshape(B, C, H, W)
    return (z,), log_det


if __name__ == "__main__":
    key = jax.random.PRNGKey(0)
    # Small shapes consistent with an image-flow input: (B=2, C=4, H=16, W=16).
    x = jax.random.normal(key, (2, 4, 16, 16), dtype=jnp.float32)

    (z,), log_det = invertible_module_forward(x, rev=False, jac=True)
    jax.block_until_ready(z)
    jax.block_until_ready(log_det)

    # Sanity checks: identity pass-through and zero log-det Jacobian.
    assert z.shape == x.shape and z.dtype == x.dtype
    assert log_det.shape == (x.shape[0],)
    assert bool(jnp.allclose(z, x))
    assert bool(jnp.allclose(log_det, 0.0))

    # jac=False reverse path.
    (z2,), no_jac = invertible_module_forward(x, rev=True, jac=False)
    jax.block_until_ready(z2)
    assert no_jac is None
    assert bool(jnp.allclose(z2, x))

    # Fastest correct realization of the contract: no kernel at all.
    (z3,), ld3 = invertible_module_forward(x, skip_kernel=True)
    jax.block_until_ready(z3)
    assert bool(jnp.allclose(z3, x)) and bool(jnp.allclose(ld3, 0.0))

    print("KERNEL_OK")
</pallas_src>

<mosaic_0001>
module attributes {stable_mosaic.version = 11 : i64} {
  func.func @_identity_copy_kernel(%arg0: i32, %arg1: memref<16x128xf32, #tpu.memory_space<vmem>>, %arg2: memref<16x128xf32, #tpu.memory_space<vmem>>) attributes {dimension_semantics = [#tpu.dimension_semantics<parallel>], iteration_bounds = array<i64: 1>, scalar_prefetch = 0 : i64, scratch_operands = 0 : i64, tpu.core_type = #tpu.core_type<tc>, window_params = [{transform_indices = @transform_0, window_bounds = array<i64: 16, 128>}, {transform_indices = @transform_1, window_bounds = array<i64: 16, 128>}]} {
    %c0 = arith.constant 0 : index
    %c0_0 = arith.constant 0 : index
    %0 = vector.load %arg1[%c0, %c0_0] : memref<16x128xf32, #tpu.memory_space<vmem>>, vector<16x128xf32>
    %c0_1 = arith.constant 0 : index
    %c0_2 = arith.constant 0 : index
    %1 = vector.load %arg2[%c0_1, %c0_2] : memref<16x128xf32, #tpu.memory_space<vmem>>, vector<16x128xf32>
    tpu.vector_store %arg2[%c0_1, %c0_2], %0 {strides = array<i32>} : memref<16x128xf32, #tpu.memory_space<vmem>>, vector<16x128xf32>,
    return
  }
  func.func @transform_0(%arg0: i32) -> (i32, i32) {
    %c0_i32 = arith.constant 0 : i32
    %c0_i32_0 = arith.constant 0 : i32
    return %arg0, %c0_i32 : i32, i32
  }
  func.func @transform_1(%arg0: i32) -> (i32, i32) {
    %c0_i32 = arith.constant 0 : i32
    %c0_i32_0 = arith.constant 0 : i32
    return %arg0, %c0_i32 : i32, i32
  }
}

</mosaic_0001>

<bundles_post_ra>
// kernel: tpu_custom_call.1
= control target key start
LH: loop header
LB: loop body
LE: loop exit
PB: predicated region body
PF: predicated region fallthrough
CT: control target
= control target key end

     0   :  { %6 = vsyncpa [#allocation3], 0  ;;  %s134_s0 = inlined_call_operand.hbm [shape: f32[16,128], index: 0, kind: input, shape index: {}, may-alias: {0,1}]   ;;  %s135_s1 = inlined_call_operand.hbm [shape: f32[16,128], index: 1, kind: output, shape index: {}, may-alias: {0,1}]  }
   0x1   :  { %7 = vsyncpa [#allocation4], 0  ;;  %s96_s6 = smov [#allocation2]   ;;  %s48_s10 = scalar_lea.hbm %s134_s0, 256 }
   0x2   :  { %s13_s7 = sshll.u32 %s96_s6, 4  ;;  %p49_p0 = scmp.ne.s32.totalorder %s134_s0, %s48_s10  ;;  %s14_s7 = int_to_ptr.vmem [resolvable:$true] %s13_s7 }
   0x3   :  { %p52_p1 = scmp.lt.u32.totalorder %s48_s10, %s134_s0 }
   0x5   :  { %p54_p2 = pnand %p52_p1, %p49_p0 }
   0x7   :  { %57 = shalt.err (!%p54_p2)
}
   0x8   :  { %s58_s15 = scalar_lea.vmem %s14_s7, 256  ;;  %p63_p4 = scmp.lt.s32.totalorder %s14_s7, %s14_s7 }
   0x9   :  { %p59_p3 = scmp.ne.s32.totalorder %s14_s7, %s58_s15  ;;  %p64_p5 = scmp.lt.s32.totalorder %s58_s15, %s58_s15 }
   0xb   :  { %p65_p6 = por %p64_p5, %p63_p4 }
   0xd   :  { %p66_p7 = pnand %p65_p6, %p59_p3 }
   0xf   :  { %69 = shalt.err (!%p66_p7)
}
  0x10   :  { %s97_s16 = smov 128   ;;  %s98_s17 = smov 8  }
  0x11   :  { %19 = dma.hbm_to_vmem [thread:$0]  %s134_s0, 256, %s14_s7, [#allocation3], %s97_s16, %s97_s16, %s98_s17  }
  0x12   :  { %92 = dma.done.wait [#allocation3], 256  }
  0x13   :  { %93 = vsyncadd [#allocation3], 4294967040  ;;  %s99_s20 = smov [#allocation5]   ;;  %v23_v0 = vld [vmem:[#allocation2] sm:$0xff]  ;;  %v24_v1 = vld [vmem:[#allocation2 + $0x8] sm:$0xff] }
  0x14   :  { %s32_s21 = sshll.u32 %s99_s20, 4  ;;  %25 = vst [vmem:[#allocation5] sm:$0xff] %v23_v0  ;;  %26 = vst [vmem:[#allocation5 + $0x8] sm:$0xff] %v24_v1  ;;  %s33_s21 = int_to_ptr.vmem [resolvable:$true] %s32_s21 }
  0x15   :  { %s70_s22 = scalar_lea.vmem %s33_s21, 256  ;;  %p75_p9 = scmp.lt.s32.totalorder %s33_s21, %s33_s21 }
  0x16   :  { %p71_p8 = scmp.ne.s32.totalorder %s33_s21, %s70_s22  ;;  %p76_p10 = scmp.lt.s32.totalorder %s70_s22, %s70_s22 }
  0x18   :  { %p77_p11 = por %p76_p10, %p75_p9 }
  0x1a   :  { %p78_p12 = pnand %p77_p11, %p71_p8 }
  0x1c   :  { %81 = shalt.err (!%p78_p12)
}
  0x1d   :  { %s82_s0 = scalar_lea.hbm %s135_s1, 256 }
  0x1e   :  { %p83_p13 = scmp.ne.s32.totalorder %s135_s1, %s82_s0  ;;  %p86_p0 = scmp.lt.u32.totalorder %s82_s0, %s135_s1 }
  0x20   :  { %p88_p1 = pnand %p86_p0, %p83_p13 }
  0x22   :  { %91 = shalt.err (!%p88_p1)
}
  0x23   :  { %38 = dma.vmem_to_hbm [thread:$0]  %s33_s21, 256, %s135_s1, [#allocation4], %s97_s16, %s97_s16, %s98_s17  }
  0x24   :  { %94 = dma.done.wait [#allocation4], 256  }
  0x25   :  { %95 = vsyncadd [#allocation4], 4294967040 }
  0x26   :  { %42 = vsyncpa [#allocation3], 1 }
  0x27   :  { %43 = vsyncpa [#allocation4], 1 }

</bundles_post_ra>
